<compile_context>
chip_gen: v7x
topology: tpu7x:2x2x1
jax: 0.10.0
libtpu: 0.0.40
codegen_flags: <defaults>
</compile_context>

<pallas_src>
import functools

import jax
import jax.numpy as jnp
from jax.experimental import pallas as pl
from jax.experimental.pallas import tpu as pltpu


def attention_matrix_jax(x1, x2, eps=1e-6):
    """JAX port of the reference attention_matrix (glue, not a kernel).

    x1, x2: (B, 1, L, W) -> (B, L(for x2), L(for x1))
    """
    euclid = jnp.sqrt(
        jnp.sum((x1 - jnp.transpose(x2, (0, 2, 1, 3))) ** 2, axis=3) + eps
    )
    return 1.0 / (euclid + 1.0)


def _wp_kernel(*refs, sentence_length, filter_width, attention):
    """Windowed (weighted) sum over w consecutive sequence rows.

    attention=True : refs = (x_ref, attn_ref, o_ref)
        x_ref    (BT, L_ext, H)   native dtype
        attn_ref (BT, L_ext, 1)   float32 (lane-1 operand -> lane broadcast)
    attention=False: refs = (x_ref, o_ref)
    o_ref (BT, L, H)

    The reduction is w static sublane-shifted window loads added on the VPU
    (roofline-neutral for a mem-bound layer, no MXU prologue/epilogue, no
    band temporaries).  Accumulation is f32 via promotion; single cast at the
    final store.
    """
    L = sentence_length
    w = filter_width
    if attention:
        x_ref, attn_ref, o_ref = refs
    else:
        x_ref, o_ref = refs
        attn_ref = None

    def window(d):
        xs = x_ref[:, pl.ds(d, L), :]                    # (BT, L, H) native dtype
        if attention:
            # (BT, L, 1) f32 broadcast over the H (lane) dim; promotes to f32.
            xs = xs * attn_ref[:, pl.ds(d, L), :]
        return xs

    acc = window(0).astype(jnp.float32)
    for d in range(1, w):
        acc = acc + window(d)                            # f32 accumulation
    if not attention:
        acc = acc * jnp.float32(1.0 / w)
    o_ref[...] = acc.astype(o_ref.dtype)


def _round_up(n, m):
    return -(-n // m) * m


def _vmem_capacity_bytes():
    try:
        return int(pltpu.get_tpu_info().vmem_capacity_bytes)
    except Exception:
        return 64 * 1024 * 1024  # conservative (v7x-sized) fallback


def wp_layer(x, sentence_length, filter_width, attention, attn_weights=None):
    """Pallas implementation of WpLayer.forward.

    x            : (B, 1, L+w-1, H)  (NCHW, channel dim == 1)
    attn_weights : (B, L+w-1) when attention=True (kept in f32)
    returns      : (B, 1, L, H)
    """
    B, C, L_ext, H = x.shape
    assert C == 1
    L = sentence_length
    w = filter_width
    assert L_ext == L + w - 1
    itemsize = jnp.dtype(x.dtype).itemsize

    # --- generation-aware VMEM budget --------------------------------------
    vmem_cap = _vmem_capacity_bytes()                  # 128 MiB v5e/v6e, 64 MiB v7x
    vmem_limit = min(vmem_cap * 3 // 4, 100 * 1024 * 1024)
    block_budget = vmem_cap * 2 // 5                   # double-buffered blocks + temps

    sub, lane = 8, 128
    x_row = _round_up(L_ext, sub) * _round_up(H, lane) * itemsize
    o_row = _round_up(L, sub) * _round_up(H, lane) * itemsize
    a_row = (_round_up(L_ext, sub) * lane * 4) if attention else 0
    # in-kernel f32 temporaries per batch row: one window slab + accumulator
    tmp_row = 2 * _round_up(L, sub) * _round_up(H, lane) * 4
    per_batch = 2 * (x_row + o_row + a_row) + tmp_row  # x2: double buffering

    bt = max(1, min(B, block_budget // max(per_batch, 1)))
    # Guarantee >=2 grid steps (DMA pipelining everywhere, megacore on v7x);
    # prefer >=4 steps when the batch is large enough that blocks stay big.
    if B >= 32:
        bt = min(bt, pl.cdiv(B, 4))
    elif B > 1:
        bt = min(bt, pl.cdiv(B, 2))
    if bt >= 8:                                        # sublane-friendly insurance
        bt = (bt // 8) * 8
    bt = max(bt, 1)
    grid = (pl.cdiv(B, bt),)

    bytes_accessed = B * (L_ext + L) * H * itemsize
    if attention:
        bytes_accessed += B * L_ext * 4
    cost = pl.CostEstimate(
        flops=2 * B * L * H * w, transcendentals=0, bytes_accessed=bytes_accessed
    )
    cparams = pltpu.CompilerParams(
        dimension_semantics=("parallel",),
        vmem_limit_bytes=int(vmem_limit),
    )

    out_shape = jax.ShapeDtypeStruct((B, 1, L, H), x.dtype)
    x_spec = pl.BlockSpec((bt, None, L_ext, H), lambda b: (b, 0, 0, 0))
    o_spec = pl.BlockSpec((bt, None, L, H), lambda b: (b, 0, 0, 0))

    kernel = functools.partial(
        _wp_kernel, sentence_length=L, filter_width=w, attention=attention
    )

    if attention:
        # Only the tiny per-position weight vector crosses HBM; shaped with a
        # trailing lane-1 dim so the in-kernel broadcast over H needs no relayout.
        attn_col = attn_weights.astype(jnp.float32)[:, :, None]   # (B, L_ext, 1)
        return pl.pallas_call(
            kernel,
            out_shape=out_shape,
            grid=grid,
            in_specs=[x_spec, pl.BlockSpec((bt, L_ext, 1), lambda b: (b, 0, 0))],
            out_specs=o_spec,
            compiler_params=cparams,
            cost_estimate=cost,
        )(x, attn_col)

    return pl.pallas_call(
        kernel,
        out_shape=out_shape,
        grid=grid,
        in_specs=[x_spec],
        out_specs=o_spec,
        compiler_params=cparams,
        cost_estimate=cost,
    )(x)


def wp_layer_ref(x, sentence_length, filter_width, attention, attn_weights=None):
    """Pure-JAX reference mirroring the PyTorch forward exactly."""
    if attention:
        aw = attn_weights[:, None, :, None]              # unsqueeze(1).unsqueeze(3)
        pools = [
            (x[:, :, i:i + filter_width, :] * aw[:, :, i:i + filter_width, :])
            .sum(axis=2, keepdims=True)
            for i in range(sentence_length)
        ]
        return jnp.concatenate(pools, axis=2)
    pools = [
        x[:, :, i:i + filter_width, :].mean(axis=2, keepdims=True)
        for i in range(sentence_length)
    ]
    return jnp.concatenate(pools, axis=2)


if __name__ == "__main__":
    B, L, W_FILT, H = 2, 8, 3, 32
    L_EXT = L + W_FILT - 1

    key = jax.random.PRNGKey(0)
    k_x, k_x1, k_x2 = jax.random.split(key, 3)

    # convolution output fed into the w-ap layer
    x = jax.random.normal(k_x, (B, 1, L_EXT, H), dtype=jnp.float32)

    # build a plausible per-position attention weight vector (B, L_ext)
    # from the pairwise attention matrix between two conv outputs.
    x1 = jax.random.normal(k_x1, (B, 1, L_EXT, H), dtype=jnp.float32)
    x2 = jax.random.normal(k_x2, (B, 1, L_EXT, H), dtype=jnp.float32)
    A = attention_matrix_jax(x1, x2)                     # (B, L_ext, L_ext)
    attn_w = A.sum(axis=1)                               # (B, L_ext)

    # attention=True path
    out_attn = wp_layer(x, L, W_FILT, attention=True, attn_weights=attn_w)
    jax.block_until_ready(out_attn)
    ref_attn = wp_layer_ref(x, L, W_FILT, attention=True, attn_weights=attn_w)
    assert out_attn.shape == (B, 1, L, H)
    assert jnp.allclose(out_attn, ref_attn, atol=1e-5, rtol=1e-5)

    # attention=False path (AvgPool2d((w,1), stride=1))
    out_avg = wp_layer(x, L, W_FILT, attention=False)
    jax.block_until_ready(out_avg)
    ref_avg = wp_layer_ref(x, L, W_FILT, attention=False)
    assert out_avg.shape == (B, 1, L, H)
    assert jnp.allclose(out_avg, ref_avg, atol=1e-5, rtol=1e-5)

    print("KERNEL_OK")
</pallas_src>

<mosaic_0001>
module attributes {stable_mosaic.version = 11 : i64} {
  func.func @_wp_kernel(%arg0: i32, %arg1: memref<1x1x10x32xf32, #tpu.memory_space<vmem>>, %arg2: memref<1x10x1xf32, #tpu.memory_space<vmem>>, %arg3: memref<1x1x8x32xf32, #tpu.memory_space<vmem>>) attributes {dimension_semantics = [#tpu.dimension_semantics<parallel>], iteration_bounds = array<i64: 2>, scalar_prefetch = 0 : i64, scratch_operands = 0 : i64, tpu.core_type = #tpu.core_type<tc>, window_params = [{transform_indices = @transform_0, window_bounds = array<i64: 1, 1, 10, 32>}, {transform_indices = @transform_1, window_bounds = array<i64: 1, 10, 1>}, {transform_indices = @transform_2, window_bounds = array<i64: 1, 1, 8, 32>}]} {
    %c0 = arith.constant 0 : index
    %c0_0 = arith.constant 0 : index
    %c0_1 = arith.constant 0 : index
    %c0_2 = arith.constant 0 : index
    %0 = vector.load %arg1[%c0, %c0_0, %c0_1, %c0_2] : memref<1x1x10x32xf32, #tpu.memory_space<vmem>>, vector<1x1x8x32xf32>
    %1 = vector.shape_cast %0 : vector<1x1x8x32xf32> to vector<1x8x32xf32>
    %c0_3 = arith.constant 0 : index
    %c0_4 = arith.constant 0 : index
    %c0_5 = arith.constant 0 : index
    %2 = vector.load %arg2[%c0_3, %c0_4, %c0_5] : memref<1x10x1xf32, #tpu.memory_space<vmem>>, vector<1x8x1xf32>
    %3 = vector.broadcast %2 : vector<1x8x1xf32> to vector<1x8x32xf32>
    %4 = arith.mulf %1, %3 : vector<1x8x32xf32>
    %c0_6 = arith.constant 0 : index
    %c0_7 = arith.constant 0 : index
    %c1 = arith.constant 1 : index
    %c0_8 = arith.constant 0 : index
    %5 = vector.load %arg1[%c0_6, %c0_7, %c1, %c0_8] : memref<1x1x10x32xf32, #tpu.memory_space<vmem>>, vector<1x1x8x32xf32>
    %6 = vector.shape_cast %5 : vector<1x1x8x32xf32> to vector<1x8x32xf32>
    %c0_9 = arith.constant 0 : index
    %c1_10 = arith.constant 1 : index
    %c0_11 = arith.constant 0 : index
    %7 = vector.load %arg2[%c0_9, %c1_10, %c0_11] : memref<1x10x1xf32, #tpu.memory_space<vmem>>, vector<1x8x1xf32>
    %8 = vector.broadcast %7 : vector<1x8x1xf32> to vector<1x8x32xf32>
    %9 = arith.mulf %6, %8 : vector<1x8x32xf32>
    %10 = arith.addf %4, %9 : vector<1x8x32xf32>
    %c0_12 = arith.constant 0 : index
    %c0_13 = arith.constant 0 : index
    %c2 = arith.constant 2 : index
    %c0_14 = arith.constant 0 : index
    %11 = vector.load %arg1[%c0_12, %c0_13, %c2, %c0_14] : memref<1x1x10x32xf32, #tpu.memory_space<vmem>>, vector<1x1x8x32xf32>
    %12 = vector.shape_cast %11 : vector<1x1x8x32xf32> to vector<1x8x32xf32>
    %c0_15 = arith.constant 0 : index
    %c2_16 = arith.constant 2 : index
    %c0_17 = arith.constant 0 : index
    %13 = vector.load %arg2[%c0_15, %c2_16, %c0_17] : memref<1x10x1xf32, #tpu.memory_space<vmem>>, vector<1x8x1xf32>
    %14 = vector.broadcast %13 : vector<1x8x1xf32> to vector<1x8x32xf32>
    %15 = arith.mulf %12, %14 : vector<1x8x32xf32>
    %16 = arith.addf %10, %15 : vector<1x8x32xf32>
    %c0_18 = arith.constant 0 : index
    %c0_19 = arith.constant 0 : index
    %c0_20 = arith.constant 0 : index
    %c0_21 = arith.constant 0 : index
    %17 = vector.load %arg3[%c0_18, %c0_19, %c0_20, %c0_21] : memref<1x1x8x32xf32, #tpu.memory_space<vmem>>, vector<1x1x8x32xf32>
    %18 = vector.shape_cast %17 : vector<1x1x8x32xf32> to vector<1x8x32xf32>
    %19 = vector.shape_cast %16 : vector<1x8x32xf32> to vector<1x1x8x32xf32>
    tpu.vector_store %arg3[%c0_18, %c0_19, %c0_20, %c0_21], %19 {strides = array<i32>} : memref<1x1x8x32xf32, #tpu.memory_space<vmem>>, vector<1x1x8x32xf32>,
    return
  }
  func.func @transform_0(%arg0: i32) -> (i32, i32, i32, i32) {
    %c0_i32 = arith.constant 0 : i32
    %c0_i32_0 = arith.constant 0 : i32
    %c0_i32_1 = arith.constant 0 : i32
    %c0_i32_2 = arith.constant 0 : i32
    return %arg0, %c0_i32, %c0_i32_0, %c0_i32_1 : i32, i32, i32, i32
  }
  func.func @transform_1(%arg0: i32) -> (i32, i32, i32) {
    %c0_i32 = arith.constant 0 : i32
    %c0_i32_0 = arith.constant 0 : i32
    %c0_i32_1 = arith.constant 0 : i32
    return %arg0, %c0_i32, %c0_i32_0 : i32, i32, i32
  }
  func.func @transform_2(%arg0: i32) -> (i32, i32, i32, i32) {
    %c0_i32 = arith.constant 0 : i32
    %c0_i32_0 = arith.constant 0 : i32
    %c0_i32_1 = arith.constant 0 : i32
    %c0_i32_2 = arith.constant 0 : i32
    return %arg0, %c0_i32, %c0_i32_0, %c0_i32_1 : i32, i32, i32, i32
  }
}

</mosaic_0001>

<bundles_post_ra>
// kernel: tpu_custom_call.1
= control target key start
LH: loop header
LB: loop body
LE: loop exit
PB: predicated region body
PF: predicated region fallthrough
CT: control target
= control target key end

     0   :  { %7 = vsyncpa [#allocation3], 0  ;;  %s516_s0 = inlined_call_operand.vmem [shape: f32[2,1,10,32], index: 0, kind: input, shape index: {}]   ;;  %s517_s1 = inlined_call_operand.vmem [shape: f32[2,10,1], index: 1, kind: input, shape index: {}]   ;;  %s518_s2 = inlined_call_operand.hbm [shape: f32[2,1,8,32], index: 2, kind: output, shape index: {}]  }
   0x1   :  { %9 = vsyncpa [#allocation3 + $0x1], 0  ;;  %s413_s9 = smov 0   ;;  %s415_s10 = smov 0  }
   0x2   :  { %s417_s11 = smov 0   ;;  %s419_s12 = smov 0  }
   0x3 LB: > { %s434_s13 = sadd.s32 4294967295, %s394_s12   ;;  %s275_s14 = sadd.s32 4294967294, %s394_s12   ;;  %s394_s12 = sphi %s419_s12, %s524_s12   ;;  %s390_s11 = sphi %s417_s11, %s523_s11   ;;  %s386_s10 = sphi %s415_s10, %s522_s10   ;;  %s382_s9 = sphi %s413_s9, %s521_s9  }
   0x4   : > { %s438_s15 = sadd.s32 1, %s394_s12   ;;  %s74_s16 = sadd.s32 1, %s390_s11 }
   0x5   : > { %s71_s17 = ssub.s32 %s394_s12, %s438_s15  ;;  %p84_p0 = scmp.ne.s32.totalorder %s390_s11, %s386_s10 }
   0x6   : > { %p72_p1 = scmp.eq.s32.totalorder %s71_s17, 0  ;;  %p85_p2 = scmp.eq.s32.totalorder %s434_s13, 1 }
   0x7   : > { %p90_p3 = scmp.ne.s32.totalorder %s386_s10, %s382_s9  ;;  %p91_p4 = scmp.eq.s32.totalorder %s275_s14, 1 }
   0x8   : > { %s449_s18 = scalar_select %p72_p1, %s390_s11, %s74_s16  }
   0x9   : > { %p451_p5 = por %p85_p2, %p84_p0  ;;  %p455_p6 = por %p91_p4, %p90_p3 }
   0xa   : > { %p278_p7 = scmp.ge.s32.totalorder %s394_s12, 1  ;;  %p125_p8 = scmp.lt.s32.totalorder %s394_s12, 3 }
   0xc   : > { %p126_p9 = pnand %p278_p7, %p125_p8 }
   0xd   : > { %p152_p10 = scmp.lt.s32.totalorder (!%p126_p9), %s434_s13, 1  ;;  %v396_v0 = vmov (!%p126_p9), 0   ;;  %s149_s26 = sand.u32 (!%p126_p9), 1, %s386_s10   ;;  %vm188_vm0 = vcmask (!%p126_p9), 261120  }
   0xe   : > { %129 = sbr.rel (%p126_p9) target bundleno = 178 (0xb2), region = 28  ;;  %330 = vset.pattern.permute.xlu0 (!%p126_p9), %v396_v0  ;;  %331 = vset.pattern.permute.xlu1 (!%p126_p9), %v396_v0  ;;  %s279_s30 = sshll.u32 (!%p126_p9), %s149_s26, 3 }
   0xf   : > { %s285_s3 = sshll.u32 (!%p126_p9), %s434_s13, 7  ;;  %s151_s4 = scalar_lea.vmem (!%p126_p9), [#allocation2], %s279_s30 }
  0x10   : > { %s204_s5 = sshll.u32 (!%p126_p9), %s151_s4, 4  ;;  %s474_s8 = scalar_lea.hbm (!%p126_p9), %s518_s2, %s285_s3  ;;  %s476_s5 = int_to_ptr.vmem [resolvable:$true] %s204_s5 }
  0x11   : > { %s191_s14 = scalar_lea.sflag (!%p126_p9), [#allocation3], %s149_s26  ;;  %s332_s16 = scalar_lea.vmem (!%p126_p9), %s476_s5, 128 }
  0x12   : > { %p333_p11 = scmp.ne.s32.totalorder (!%p126_p9), %s476_s5, %s332_s16 }
  0x14   : > { %p334_p12 = pnand (!%p126_p9), %p333_p11, %p451_p5 }
  0x15   : > { %s153_s21 = scalar_select %p152_p10, %s434_s13, 1 }
  0x16   : > { %p335_p13 = pneg %p334_p12  ;;  %s397_s13 = smov [#allocation2]  }
  0x17   : > { %s288_s22 = sshll.u32 %s153_s21, 4  ;;  %s336_s17 = sshll.u32 %s397_s13, 4  ;;  %s337_s17 = int_to_ptr.vmem [resolvable:$false] %s336_s17 }
  0x18   : > { %s161_s25 = scalar_lea.vmem %s517_s1, %s288_s22  ;;  %s156_s29 = scalar_lea.vmem %s516_s0, %s288_s22 }
  0x19   : > { %v163_v1 = vld [vmem:[%s161_s25] sm:$0xff]  ;;  %s338_s21 = scalar_lea.vmem %s337_s17, 256  ;;  %p339_p0 = scmp.lt.s32.totalorder %s476_s5, %s337_s17 }
  0x1a   : > { %v180_v2 = vld [vmem:[%s161_s25 + $0x2] sm:$0xff]  ;;  %166 = vperm.xlu0 %330, %v163_v1   ;;  %p340_p1 = scmp.lt.s32.totalorder %s338_s21, %s332_s16 }
  0x1b   : > { %183 = vperm.xlu1 %331, %v180_v2   ;;  %v171_v3 = vld [vmem:[%s161_s25 + $0x1] sm:$0xff] }
  0x1c   : > { %v162_v5 = vld [vmem:[%s156_s29] sm:$0xff]  ;;  %p341_p2 = por %p340_p1, %p339_p0 }
  0x1d   : > { %v170_v6 = vld [vmem:[%s156_s29 + $0x1] sm:$0xff] }
  0x1e   : > { %174 = vperm.xlu0 %330, %v171_v3   ;;  %v179_v8 = vld [vmem:[%s156_s29 + $0x2] sm:$0xff]  ;;  %p342_p3 = pnand %p341_p2, %p335_p13 }
  0x99   : > { %v167_v4 = vpop.permute.xlu0 %166 }
  0x9a   : > { %v184_v7 = vpop.permute.xlu1 %183  ;;  %v169_v10 = vmul.f32 %v167_v4, %v162_v5 }
  0x9b   : > { %v186_v12 = vmul.f32 %v184_v7, %v179_v8 }
  0x9d   : > { %v175_v9 = vpop.permute.xlu0 %174 }
  0x9e   : > { %v177_v11 = vmul.f32 %v175_v9, %v170_v6 }
  0xa0   : > { %v178_v13 = vadd.f32 %v177_v11, %v169_v10 }
  0xa2   : > { %v187_v14 = vadd.f32 %v186_v12, %v178_v13 }
  0xa4   : > { %189 = vst.msk [vmem:[%s151_s4] sm:$0xff] %vm188_vm0, %v187_v14 }
  0xa5   : > { %345 = shalt.err (!%p342_p3)
}
  0xa6   : > { %s346_s22 = scalar_lea.hbm %s474_s8, 128  ;;  %s350_s25 = scalar_lea.hbm %s518_s2, 256 }
  0xa7   : > { %p347_p4 = scmp.ne.s32.totalorder %s474_s8, %s346_s22  ;;  %p351_p9 = scmp.lt.u32.totalorder %s474_s8, %s518_s2 }
  0xa8   : > { %p352_p10 = scmp.lt.u32.totalorder %s350_s25, %s346_s22  ;;  %p354_p12 = scmp.lt.u32.totalorder %s346_s22, %s474_s8 }
  0xa9   : > { %p348_p7 = pnand %p347_p4, %p451_p5 }
  0xaa   : > { %p353_p11 = por %p352_p10, %p351_p9 }
  0xab   : > { %p349_p8 = pneg %p348_p7 }
  0xac   : > { %p355_p13 = por %p354_p12, %p353_p11 }
  0xae   : > { %p356_p0 = pnand %p355_p13, %p349_p8 }
  0xb0   : > { %359 = shalt.err (!%p356_p0)
}
  0xb1   : > { %290 = dma.vmem_to_hbm [thread:$0]  (%p451_p5), %s476_s5, 128, %s474_s8, %s191_s14  }
  0xb2 PF: > { %p296_p1 = scmp.ge.s32.totalorder %s394_s12, 2  ;;  %s216_s28 = sand.u32 1, %s382_s9  }
  0xb3   : > { %s217_s29 = scalar_lea.sflag [#allocation3], %s216_s28 }
  0xb4   : > { %p293_p2 = pnand %p296_p1, %p455_p6 }
  0xb6   : > { %377 = dma.done.wait (!%p293_p2), %s217_s29, 128  }
  0xb7   : > { %379 = vsyncadd (!%p293_p2), %s217_s29, 4294967168  ;;  %p12_p3 = scmp.ge.s32.totalorder %s438_s15, 4   ;;  %s521_s9 = smov %s386_s10 }
  0xb8   : > { %s522_s10 = smov %s390_s11  ;;  %s523_s11 = smov %s449_s18 }
  0xb9   : > { %s524_s12 = smov %s438_s15  ;;  %14 = sbr.rel (!%p12_p3) target bundleno = 3 (0x3), region = 66 }
  0xc0   :  { %222 = vsyncpa [#allocation3], 1 }
  0xc1   :  { %224 = vsyncpa [#allocation3 + $0x1], 1 }

</bundles_post_ra>
